<compile_context>
chip_gen: v7x
topology: tpu7x:2x2x1
jax: 0.10.0
libtpu: 0.0.40
codegen_flags: <defaults>
</compile_context>

<pallas_src>
import functools

import jax
import jax.numpy as jnp
from jax.experimental import pallas as pl
from jax.experimental.pallas import tpu as pltpu


def _identity(x):
    # activation_function(x) == output_function(x) == x in the reference module.
    return x


def _output_layer_kernel(w_ref, x_ref, b_ref, o_ref):
    # forward_function_w_b: weights @ x + biases  (MXU matmul, VPU bias add)
    acc = jnp.dot(w_ref[...], x_ref[...], preferred_element_type=jnp.float32)
    acc = acc + b_ref[...]                       # (bm, 1) broadcast over lane axis
    # identity activation + identity output_function, fused in-kernel
    o_ref[...] = _identity(_identity(acc)).astype(o_ref.dtype)


@functools.partial(jax.jit, static_argnames=("tm", "tn"))
def output_layer_forward(weights, biases, x, *, tm=256, tn=512):
    """Pallas equivalent of OutputLayer(size, input_layer).forward(x).

    weights: (size, in_size)   float32
    biases : (size, 1)         float32
    x      : (in_size, batch)  float32
    returns: (size, batch)     float32  ==  weights @ x + biases
    """
    M, K = weights.shape
    K2, N = x.shape
    assert K == K2, "weights / x contraction-dimension mismatch"
    assert biases.shape == (M, 1), "biases must have shape (size, 1)"

    # Full-extent blocks when a dim is small (single grid step for tiny MLP
    # layers); otherwise (8, 128)-aligned tiles.  K is never split, so there is
    # no reduction raggedness and no accumulator scratch needed.
    bm = M if M <= tm else tm      # tm is a multiple of 8   (sublane-aligned)
    bn = N if N <= tn else tn      # tn is a multiple of 128 (lane-aligned)
    grid = (pl.cdiv(M, bm), pl.cdiv(N, bn))

    # Advisory cost hint for XLA's scheduler around the custom call.
    cost = pl.CostEstimate(
        flops=2 * M * N * K + M * N,
        transcendentals=0,
        bytes_accessed=4 * (M * K + K * N + M + M * N),
    )

    return pl.pallas_call(
        _output_layer_kernel,
        out_shape=jax.ShapeDtypeStruct((M, N), x.dtype),
        grid=grid,
        in_specs=[
            pl.BlockSpec((bm, K), lambda i, j: (i, 0)),   # weights row-tile, K whole
            pl.BlockSpec((K, bn), lambda i, j: (0, j)),   # x column-tile,   K whole
            pl.BlockSpec((bm, 1), lambda i, j: (i, 0)),   # bias column for this row-tile
        ],
        out_specs=pl.BlockSpec((bm, bn), lambda i, j: (i, j)),
        compiler_params=pltpu.CompilerParams(
            # Both grid axes independent -> can shard across the 2 TensorCores
            # on v7x; costs nothing on single-TC v5e/v6e.
            dimension_semantics=("parallel", "parallel"),
        ),
        cost_estimate=cost,
    )(weights, x, biases)


if __name__ == "__main__":
    key = jax.random.PRNGKey(0)
    k_w, k_b, k_x = jax.random.split(key, 3)

    # Small shapes consistent with the module: input_layer.size=32 (hidden),
    # OutputLayer size=16, batch of 8 column vectors.
    in_size, out_size, batch = 32, 16, 8
    weights = jax.random.normal(k_w, (out_size, in_size), dtype=jnp.float32)
    biases = jax.random.normal(k_b, (out_size, 1), dtype=jnp.float32)
    x = jax.random.normal(k_x, (in_size, batch), dtype=jnp.float32)

    y = output_layer_forward(weights, biases, x)
    y = jax.block_until_ready(y)

    # Reference semantics: output_function(activation(weights @ x + biases)) == W @ x + b
    y_ref = jnp.dot(weights, x, preferred_element_type=jnp.float32) + biases

    assert y.shape == (out_size, batch) and y.dtype == jnp.float32
    assert bool(jnp.allclose(y, y_ref, rtol=1e-2, atol=1e-2))

    print("KERNEL_OK")
</pallas_src>

<mosaic_0001>
module attributes {stable_mosaic.version = 11 : i64} {
  func.func @_output_layer_kernel(%arg0: i32, %arg1: i32, %arg2: memref<16x32xf32, #tpu.memory_space<vmem>>, %arg3: memref<32x8xf32, #tpu.memory_space<vmem>>, %arg4: memref<16x1xf32, #tpu.memory_space<vmem>>, %arg5: memref<16x8xf32, #tpu.memory_space<vmem>>) attributes {dimension_semantics = [#tpu.dimension_semantics<parallel>, #tpu.dimension_semantics<parallel>], iteration_bounds = array<i64: 1, 1>, scalar_prefetch = 0 : i64, scratch_operands = 0 : i64, tpu.core_type = #tpu.core_type<tc>, window_params = [{transform_indices = @transform_0, window_bounds = array<i64: 16, 32>}, {transform_indices = @transform_1, window_bounds = array<i64: 32, 8>}, {transform_indices = @transform_2, window_bounds = array<i64: 16, 1>}, {transform_indices = @transform_3, window_bounds = array<i64: 16, 8>}]} {
    %c0 = arith.constant 0 : index
    %c0_0 = arith.constant 0 : index
    %0 = vector.load %arg2[%c0, %c0_0] : memref<16x32xf32, #tpu.memory_space<vmem>>, vector<16x32xf32>
    %c0_1 = arith.constant 0 : index
    %c0_2 = arith.constant 0 : index
    %1 = vector.load %arg3[%c0_1, %c0_2] : memref<32x8xf32, #tpu.memory_space<vmem>>, vector<32x8xf32>
    %cst = arith.constant dense<0.000000e+00> : vector<16x8xf32>
    %2 = tpu.matmul %0, %1, %cst {dimension_numbers = #tpu.dot_dimension_numbers<[1], [0], [0], [1], [0, 0, 1, 1], [], []>} : vector<16x32xf32>, vector<32x8xf32>, vector<16x8xf32> -> vector<16x8xf32>
    %c0_3 = arith.constant 0 : index
    %c0_4 = arith.constant 0 : index
    %3 = vector.load %arg4[%c0_3, %c0_4] : memref<16x1xf32, #tpu.memory_space<vmem>>, vector<16x1xf32>
    %4 = vector.broadcast %3 : vector<16x1xf32> to vector<16x8xf32>
    %5 = arith.addf %2, %4 : vector<16x8xf32>
    %c0_5 = arith.constant 0 : index
    %c0_6 = arith.constant 0 : index
    %6 = vector.load %arg5[%c0_5, %c0_6] : memref<16x8xf32, #tpu.memory_space<vmem>>, vector<16x8xf32>
    tpu.vector_store %arg5[%c0_5, %c0_6], %5 {strides = array<i32>} : memref<16x8xf32, #tpu.memory_space<vmem>>, vector<16x8xf32>,
    return
  }
  func.func @transform_0(%arg0: i32, %arg1: i32) -> (i32, i32) {
    %c0_i32 = arith.constant 0 : i32
    %c0_i32_0 = arith.constant 0 : i32
    return %arg0, %c0_i32 : i32, i32
  }
  func.func @transform_1(%arg0: i32, %arg1: i32) -> (i32, i32) {
    %c0_i32 = arith.constant 0 : i32
    %c0_i32_0 = arith.constant 0 : i32
    return %c0_i32, %arg1 : i32, i32
  }
  func.func @transform_2(%arg0: i32, %arg1: i32) -> (i32, i32) {
    %c0_i32 = arith.constant 0 : i32
    %c0_i32_0 = arith.constant 0 : i32
    return %arg0, %c0_i32 : i32, i32
  }
  func.func @transform_3(%arg0: i32, %arg1: i32) -> (i32, i32) {
    %c0_i32 = arith.constant 0 : i32
    return %arg0, %arg1 : i32, i32
  }
}

</mosaic_0001>

<bundles_post_ra>
// kernel: output_layer_forward.1
= control target key start
LH: loop header
LB: loop body
LE: loop exit
PB: predicated region body
PF: predicated region fallthrough
CT: control target
= control target key end

     0   :  { %vm32_vm0 = vcmask 261120   ;;  %v150_v3 = vmov 0   ;;  %vm114_vm1 = vcmask 64512   ;;  %s203_s1 = inlined_call_operand.vmem [shape: f32[32,8], index: 1, kind: input, shape index: {}]   ;;  %s204_s0 = inlined_call_operand.vmem [shape: f32[16,32], index: 0, kind: input, shape index: {}]   ;;  %s205_s2 = inlined_call_operand.vmem [shape: f32[16,1], index: 2, kind: input, shape index: {}]   ;;  %s206_s3 = inlined_call_operand.vmem [shape: f32[16,8], index: 3, kind: output, shape index: {}]  }
   0x1   :  { %v16_v0 = vld [vmem:[%s203_s1] sm:$0xff]  ;;  %v17_v1 = vld [vmem:[%s203_s1 + $0x8] sm:$0xff]  ;;  %v18_v2 = vld [vmem:[%s203_s1 + $0x10] sm:$0xff]  ;;  %149 = vset.pattern.permute.xlu0 %v150_v3 }
   0x2   :  { %v140_v4 = vpack.c.bf16 %v17_v1, %v16_v0  ;;  %v19_v5 = vld [vmem:[%s203_s1 + $0x18] sm:$0xff]  ;;  %v14_v6 = vld [vmem:[%s204_s0] sm:$0xff]  ;;  %v21_v9 = vld [vmem:[%s205_s2 + $0x8] sm:$0xff] }
   0x3   :  { %v144_v7 = vpack.c.bf16 %v19_v5, %v18_v2  ;;  %137 = vmatprep.mubr.msk.f32.mxu0 %vm32_vm0, %v14_v6  ;;  %v20_v8 = vld [vmem:[%s205_s2] sm:$0xff]  ;;  %v15_v10 = vld [vmem:[%s204_s0 + $0x8] sm:$0xff] }
   0x4   :  { %141 = vmatprep.subr.bf16.mxu0 %v140_v4  ;;  %24 = vperm.xlu0 %149, %v20_v8  }
   0x5   :  { %143 = vmatpush3.bf16.msra.mxu0 %v140_v4 }
   0x6   :  { %145 = vmatprep.subr.bf16.mxu0 %v144_v7 }
   0x8   :  { %29 = vperm.xlu0 %149, %v21_v9  }
   0x9   :  { %147 = vmatpush3.bf16.msra.mxu0 %v144_v7 }
   0xc   :  { %138 = vmatmul.mubr.msk.f32.vlgmr.msra.gmra.mrb[0].mxu0 %vm32_vm0, %v15_v10 }
  0x83   :  { %v25_v11 = vpop.permute.xlu0 %24 }
  0x87   :  { %v30_v12 = vpop.permute.xlu0 %29 }
  0xdf   :  { %v139_v13 = vpop.f32.mrb[0].mxu0 }
  0xe0   :  { %v111_v14 = vadd.f32 %v139_v13, %v30_v12  ;;  %v105_v15 = vpop.f32.mrb[1].mxu0 }
  0xe1   :  { %v106_v16 = vadd.f32 %v105_v15, %v25_v11 }
  0xe2   :  { %116 = vst.msk [vmem:[%s206_s3 + $0x8] sm:$0xff] %vm114_vm1, %v111_v14 }
  0xe3   :  { %115 = vst.msk [vmem:[%s206_s3] sm:$0xff] %vm114_vm1, %v106_v16 }

</bundles_post_ra>
